<compile_context>
chip_gen: v5e
topology: v5e:2x2
jax: 0.10.0
libtpu: 0.0.40
codegen_flags: <defaults>
</compile_context>

<pallas_src>
import functools

import jax
import jax.numpy as jnp
from jax.experimental import pallas as pl
from jax.experimental.pallas import tpu as pltpu


# ------------------------- generation-aware budgets -------------------------


def _round_up(x, m):
    return ((x + m - 1) // m) * m


def _tpu_budgets():
    """Return (vmem_limit_bytes, target_block_bytes) per TPU generation."""
    try:
        cap = pltpu.get_tpu_info().vmem_capacity_bytes
    except Exception:
        cap = None
    if cap is not None and cap >= 100 * 1024 * 1024:
        # v5e / v6e: 128 MiB physical VMEM -> big blocks, generous limit.
        return 64 * 1024 * 1024, 8 * 1024 * 1024
    # v7x (64 MiB VMEM) or unknown: in+out double-buffered ~= 4x block bytes,
    # keep headroom for compiler scratch.
    return 48 * 1024 * 1024, 4 * 1024 * 1024


_VMEM_LIMIT, _TARGET_BLOCK_BYTES = _tpu_budgets()


# ----------------------------- kernels --------------------------------------


def _sigmoid_kernel(x_ref, o_ref):
    x = x_ref[...].astype(jnp.float32)
    # sigmoid(x) = 0.5 * (tanh(x/2) + 1): exact, and a single EUP op per
    # element (vs exp + reciprocal), so the kernel stays HBM-bound on v7x too.
    o_ref[...] = (0.5 * (jnp.tanh(0.5 * x) + 1.0)).astype(o_ref.dtype)


def _softmax_axis1_kernel(x_ref, o_ref):
    # Channel axis is axis=1 (a leading block dim); spatial positions live on
    # the (sublane, lane) axes, so max/sum over channels is cheap VALU work.
    x = x_ref[...].astype(jnp.float32)
    m = jnp.max(x, axis=1, keepdims=True)
    e = jnp.exp(x - m)
    s = jnp.sum(e, axis=1, keepdims=True)
    # Exact EUP reciprocal keeps the divide off the VALU slot.
    o_ref[...] = (e * pl.reciprocal(s, approx=False)).astype(o_ref.dtype)


# ----------------------------- wrappers --------------------------------------


def _largest_lane_divisor(t):
    """Largest multiple-of-128 (<=1024) that divides t, else None."""
    for lanes in (1024, 896, 768, 640, 512, 384, 256, 128):
        if t % lanes == 0:
            return lanes
    return None


def _elementwise_call(kernel, x):
    """Run an elementwise kernel over a flattened, lane-dense 2D view."""
    orig_shape = x.shape
    dtype = x.dtype
    itemsize = jnp.dtype(dtype).itemsize
    t = x.size
    if t == 0:
        return x

    flat = x.reshape(-1)
    lanes = _largest_lane_divisor(t)
    padded = False
    if lanes is None:
        # Ragged total size: pad the flat view once (rare fallback).
        lanes = 128
        pad = _round_up(t, lanes) - t
        flat = jnp.pad(flat, (0, pad))
        padded = True
    rows = flat.shape[0] // lanes
    x2 = flat.reshape(rows, lanes)

    # ~4-8 MiB blocks (generation-dependent); bf16 gets 2x the rows for the
    # same bytes.  Partial last block is handled (masked) by Pallas, so no
    # row padding is ever materialized.
    target_rows = max(8, (_TARGET_BLOCK_BYTES // (lanes * itemsize)) // 8 * 8)
    if rows < 16:
        block_rows = rows  # single full-extent block (legal for any size)
    elif rows <= target_rows:
        # Split into >=2 parallel blocks so both v7x TensorCores get work.
        block_rows = _round_up(pl.cdiv(rows, 2), 8)
    else:
        block_rows = target_rows
    grid = (pl.cdiv(rows, block_rows),)

    out2 = pl.pallas_call(
        kernel,
        out_shape=jax.ShapeDtypeStruct((rows, lanes), dtype),
        grid=grid,
        in_specs=[pl.BlockSpec((block_rows, lanes), lambda i: (i, 0))],
        out_specs=pl.BlockSpec((block_rows, lanes), lambda i: (i, 0)),
        compiler_params=pltpu.CompilerParams(
            dimension_semantics=("parallel",),
            vmem_limit_bytes=_VMEM_LIMIT,
        ),
    )(x2)

    out = out2.reshape(-1)
    if padded:
        out = out[:t]
    return out.reshape(orig_shape)


def _softmax2d_call(x):
    """softmax over dim=1 of an (N, C, ...) tensor (matches torch.softmax)."""
    if x.ndim < 2:
        raise ValueError("softmax2d expects an input with at least 2 dims")
    n, c = x.shape[0], x.shape[1]
    hw = 1
    for d in x.shape[2:]:
        hw *= d
    dtype = x.dtype
    itemsize = jnp.dtype(dtype).itemsize

    if hw >= 128 and hw % 128 == 0:
        # Lane-dense layout: spatial -> (rows, 128) on (sublane, lane),
        # channels as a leading block dim (reduction stays block-local).
        hw_rows = hw // 128
        x4 = x.reshape(n, c, hw_rows, 128)
        target_rows = max(
            8, (_TARGET_BLOCK_BYTES // (c * 128 * itemsize)) // 8 * 8
        )
        r_tile = hw_rows if hw_rows <= target_rows else target_rows
        grid = (n, pl.cdiv(hw_rows, r_tile))

        out = pl.pallas_call(
            _softmax_axis1_kernel,
            out_shape=jax.ShapeDtypeStruct((n, c, hw_rows, 128), dtype),
            grid=grid,
            in_specs=[
                pl.BlockSpec((1, c, r_tile, 128), lambda i, j: (i, 0, j, 0))
            ],
            out_specs=pl.BlockSpec(
                (1, c, r_tile, 128), lambda i, j: (i, 0, j, 0)
            ),
            compiler_params=pltpu.CompilerParams(
                dimension_semantics=("parallel", "parallel"),
                vmem_limit_bytes=_VMEM_LIMIT,
            ),
        )(x4)
        return out.reshape(x.shape)

    # Fallback for ragged spatial sizes: one full-extent (c, hw) block per
    # batch element (last two block dims equal the full array dims -> legal).
    x3 = x.reshape(n, c, hw)
    out = pl.pallas_call(
        _softmax_axis1_kernel,
        out_shape=jax.ShapeDtypeStruct((n, c, hw), dtype),
        grid=(n,),
        in_specs=[pl.BlockSpec((1, c, hw), lambda i: (i, 0, 0))],
        out_specs=pl.BlockSpec((1, c, hw), lambda i: (i, 0, 0)),
        compiler_params=pltpu.CompilerParams(
            dimension_semantics=("parallel",),
            vmem_limit_bytes=_VMEM_LIMIT,
        ),
    )(x3)
    return out.reshape(x.shape)


class Activation:
    """JAX/Pallas port of the PyTorch Activation module."""

    def __init__(self, activation):
        if activation is None or activation == "identity":
            # Short-circuit: no kernel, no HBM copy.
            self._fn = lambda x: x
        elif activation == "sigmoid":
            self._fn = functools.partial(_elementwise_call, _sigmoid_kernel)
        elif activation == "softmax2d":
            self._fn = _softmax2d_call
        elif callable(activation):
            # TODO(synk): arbitrary callables are passed through as plain JAX,
            # not lowered to a Pallas kernel.
            self._fn = activation
        else:
            raise ValueError(
                "Activation should be 'sigmoid'/'softmax2d'/'identity'/None/callable"
            )

    def __call__(self, x):
        return self._fn(x)


# ------------------------------- main ---------------------------------------


if __name__ == "__main__":
    key = jax.random.PRNGKey(0)
    # NCHW input, small shapes: batch=2, channels=4, spatial=16x16
    x = jax.random.normal(key, (2, 4, 16, 16), dtype=jnp.float32)

    # identity (no kernel launch)
    act_id = Activation("identity")
    y_id = jax.block_until_ready(act_id(x))
    assert jnp.allclose(y_id, x)

    # sigmoid (exact tanh identity inside the kernel)
    act_sig = Activation("sigmoid")
    y_sig = jax.block_until_ready(act_sig(x))
    ref_sig = jax.nn.sigmoid(x)
    assert jnp.allclose(y_sig, ref_sig, atol=1e-5, rtol=1e-5)
    assert y_sig.shape == x.shape and y_sig.dtype == x.dtype

    # softmax2d (softmax over channel dim=1)
    act_sm = Activation("softmax2d")
    y_sm = jax.block_until_ready(act_sm(x))
    ref_sm = jax.nn.softmax(x, axis=1)
    assert jnp.allclose(y_sm, ref_sm, atol=1e-6, rtol=1e-5)
    assert y_sm.shape == x.shape and y_sm.dtype == x.dtype

    # arbitrary callable pass-through
    act_fn = Activation(lambda t: t * 2.0)
    y_fn = jax.block_until_ready(act_fn(x))
    assert jnp.allclose(y_fn, x * 2.0)

    print("KERNEL_OK")
</pallas_src>

<mosaic_0001>
module attributes {stable_mosaic.version = 11 : i64} {
  func.func @_sigmoid_kernel(%arg0: i32, %arg1: memref<2x1024xf32, #tpu.memory_space<vmem>>, %arg2: memref<2x1024xf32, #tpu.memory_space<vmem>>) attributes {dimension_semantics = [#tpu.dimension_semantics<parallel>], iteration_bounds = array<i64: 1>, scalar_prefetch = 0 : i64, scratch_operands = 0 : i64, tpu.core_type = #tpu.core_type<tc>, window_params = [{transform_indices = @transform_0, window_bounds = array<i64: 2, 1024>}, {transform_indices = @transform_1, window_bounds = array<i64: 2, 1024>}]} {
    %c0 = arith.constant 0 : index
    %c0_0 = arith.constant 0 : index
    %0 = vector.load %arg1[%c0, %c0_0] : memref<2x1024xf32, #tpu.memory_space<vmem>>, vector<2x1024xf32>
    %cst = arith.constant 5.000000e-01 : f32
    %1 = vector.broadcast %cst : f32 to vector<2x1024xf32>
    %2 = arith.mulf %1, %0 : vector<2x1024xf32>
    %3 = math.tanh %2 : vector<2x1024xf32>
    %cst_1 = arith.constant 1.000000e+00 : f32
    %4 = vector.broadcast %cst_1 : f32 to vector<2x1024xf32>
    %5 = arith.addf %3, %4 : vector<2x1024xf32>
    %cst_2 = arith.constant 5.000000e-01 : f32
    %6 = vector.broadcast %cst_2 : f32 to vector<2x1024xf32>
    %7 = arith.mulf %6, %5 : vector<2x1024xf32>
    %c0_3 = arith.constant 0 : index
    %c0_4 = arith.constant 0 : index
    %8 = vector.load %arg2[%c0_3, %c0_4] : memref<2x1024xf32, #tpu.memory_space<vmem>>, vector<2x1024xf32>
    tpu.vector_store %arg2[%c0_3, %c0_4], %7 {strides = array<i32>} : memref<2x1024xf32, #tpu.memory_space<vmem>>, vector<2x1024xf32>,
    return
  }
  func.func @transform_0(%arg0: i32) -> (i32, i32) {
    %c0_i32 = arith.constant 0 : i32
    %c0_i32_0 = arith.constant 0 : i32
    return %arg0, %c0_i32 : i32, i32
  }
  func.func @transform_1(%arg0: i32) -> (i32, i32) {
    %c0_i32 = arith.constant 0 : i32
    %c0_i32_0 = arith.constant 0 : i32
    return %arg0, %c0_i32 : i32, i32
  }
}

</mosaic_0001>

<bundles_post_ra>
// kernel: tpu_custom_call.1
= control target key start
LH: loop header
LB: loop body
LE: loop exit
PB: predicated region body
PF: predicated region fallthrough
CT: control target
= control target key end

     0   :  { %6 = vsyncpa [#allocation3], 0  ;;  %s128_s0 = inlined_call_operand.hbm [shape: f32[2,1024], index: 0, kind: input, shape index: {}]   ;;  %s129_s1 = inlined_call_operand.hbm [shape: f32[2,1024], index: 1, kind: output, shape index: {}]  }
   0x1   :  { %7 = vsyncpa [#allocation4], 0  ;;  %s13_s8 = sshll.u32 %s128_s0, 4  ;;  %s110_s9 = smov [#allocation2]   ;;  %s14_s8 = int_to_ptr.hbm [resolvable:$true] %s13_s8 }
   0x2   :  { %s15_s10 = sshll.u32 %s110_s9, 4  ;;  %s16_s10 = int_to_ptr.vmem [resolvable:$true] %s15_s10 }
   0x3   :  { %18 = dma.hbm_to_vmem [thread:$0]  %s14_s8, 256, %s16_s10, [#allocation3]  }
   0x4   :  { %106 = dma.done.wait [#allocation3], 256  }
   0x5   :  { %107 = vsyncadd [#allocation3], 4294967040  ;;  %v23_v0 = vld [vmem:[#allocation2] sm:$0xff]  ;;  %v24_v1 = vld [vmem:[#allocation2 + $0x8] sm:$0xff]  ;;  %s111_s11 = smov [#allocation5]   ;;  %s42_s14 = sshll.u32 %s129_s1, 4  ;;  %s43_s14 = int_to_ptr.hbm [resolvable:$true] %s42_s14 }
   0x6   :  { %v25_v2 = vmul.f32 0.5, %v23_v0  ;;  %v26_v3 = vmul.f32 0.5, %v24_v1  ;;  %s40_s12 = sshll.u32 %s111_s11, 4  ;;  %s41_s12 = int_to_ptr.vmem [resolvable:$true] %s40_s12 }
   0x8   :  { %54 = vtanh.f32 %v25_v2 }
   0x9   :  { %56 = vtanh.f32 %v26_v3 }
   0xe   :  { %v55_v4 = vpop.eup %54 }
   0xf   :  { %v57_v5 = vpop.eup %56  ;;  %v29_v6 = vadd.f32 1.0, %v55_v4 }
  0x10   :  { %v30_v7 = vadd.f32 1.0, %v57_v5 }
  0x11   :  { %v31_v8 = vmul.f32 0.5, %v29_v6 }
  0x12   :  { %v32_v9 = vmul.f32 0.5, %v30_v7 }
  0x13   :  { %33 = vst [vmem:[#allocation5] sm:$0xff] %v31_v8 }
  0x14   :  { %34 = vst [vmem:[#allocation5 + $0x8] sm:$0xff] %v32_v9 }
  0x15   :  { %45 = dma.vmem_to_hbm [thread:$0]  %s41_s12, 256, %s43_s14, [#allocation4]  }
  0x16   :  { %108 = dma.done.wait [#allocation4], 256  }
  0x17   :  { %109 = vsyncadd [#allocation4], 4294967040 }
  0x18   :  { %50 = vsyncpa [#allocation3], 1 }
  0x19   :  { %51 = vsyncpa [#allocation4], 1 }

</bundles_post_ra>
